<compile_context>
chip_gen: v6e
topology: v6e:2x2x1
jax: 0.10.0
libtpu: 0.0.40
codegen_flags: <defaults>
</compile_context>

<pallas_src>
import jax
import jax.numpy as jnp
from jax.experimental import pallas as pl
from jax.experimental.pallas import tpu as pltpu


def _categorical1d_kernel(x_ref, w_ref, b_ref, o_ref):
    # Linear: [TB, Din] @ [Din, Dout] + [1, Dout]   (MXU, f32 accumulation)
    logits = jnp.dot(
        x_ref[...], w_ref[...], preferred_element_type=jnp.float32
    ) + b_ref[...]
    # Numerically-stable softmax over the output-feature axis (torch dim=1).
    m = jnp.max(logits, axis=-1, keepdims=True)
    e = jnp.exp(logits - m)
    denom = jnp.sum(e, axis=-1, keepdims=True)
    # Exact division: rows sum to 1 within f32 rounding (approx reciprocal
    # was too loose for downstream Categorical(probs=...) consumers).
    o_ref[...] = (e / denom).astype(o_ref.dtype)


def _round_up(v, m):
    return (v + m - 1) // m * m


def _choose_batch_tiling(B, Din, Dout, *, target_step_bytes=2 << 20,
                         tb_cap=4096, vmem_budget=24 << 20):
    """Pick (TB, ntiles, B_pad): big enough to amortize per-step overhead,
    small enough to fit VMEM, divisor-aware to minimize batch padding."""
    per_row_bytes = 4 * (Din + Dout)            # one x row read + one out row write
    # Amortize ~0.35 us per grid step: target >= ~2 MiB of useful DMA per step.
    tb = max(8, _round_up(max(1, target_step_bytes // per_row_bytes), 8))
    tb = min(tb, tb_cap)
    # VMEM budget: resident weight + bias + double-buffered (x, out) tiles.
    fixed_bytes = 4 * (Din * Dout + Dout)
    avail = vmem_budget - fixed_bytes
    if avail > 0:
        tb_fit = max(8, (avail // (2 * per_row_bytes)) // 8 * 8)
        tb = min(tb, tb_fit)
    else:
        tb = 8  # weight alone exceeds the budget; see TODO(synk) above.
    # Divisor-aware tiling so B_pad - B < 8 * ntiles (avoid ~2x wasted traffic
    # when B is just above a TB multiple).
    ntiles = -(-B // tb)
    if ntiles == 1 and B >= 16:
        ntiles = 2  # give both v7x TensorCores a grid step (no-op on v5e/v6e)
    tb = _round_up(-(-B // ntiles), 8)
    b_pad = ntiles * tb
    return tb, ntiles, b_pad


def categorical_layer_1d(x, weight_t, bias):
    """x: [B, Din] f32, weight_t: [Din, Dout] f32, bias: [Dout] f32
    -> probs [B, Dout] f32 (softmax(x @ W + b, axis=1))."""
    x = x.astype(jnp.float32)
    weight_t = weight_t.astype(jnp.float32)
    B, Din = x.shape
    Dout = weight_t.shape[1]

    TB, ntiles, B_p = _choose_batch_tiling(B, Din, Dout)

    # Only the batch may need zero-row padding (sliced off below).  Feature
    # dims are passed unpadded: full-extent block dims are always legal.
    if B_p > B:
        x_in = jnp.zeros((B_p, Din), jnp.float32).at[:B, :].set(x)
    else:
        x_in = x
    b_in = bias.astype(jnp.float32).reshape(1, Dout)

    # VMEM sizing (2x margin, clamped to [32 MiB, 48 MiB]): raises v5e's
    # 16 MiB scoped default, stays under v7x's 64 MiB physical.
    needed = 4 * (Din * Dout + Dout) + 2 * 4 * TB * (Din + Dout)
    vmem_limit = int(min(max(2 * needed, 32 << 20), 48 << 20))

    cost = pl.CostEstimate(
        flops=2 * B_p * Din * Dout,
        transcendentals=B_p * Dout,
        bytes_accessed=4 * (B_p * Din + Din * Dout + Dout + B_p * Dout),
    )

    out_p = pl.pallas_call(
        _categorical1d_kernel,
        out_shape=jax.ShapeDtypeStruct((B_p, Dout), jnp.float32),
        grid_spec=pl.GridSpec(
            grid=(ntiles,),
            in_specs=[
                pl.BlockSpec((TB, Din), lambda i: (i, 0)),    # x tile (pipelined)
                pl.BlockSpec((Din, Dout), lambda i: (0, 0)),  # weight, VMEM-resident
                pl.BlockSpec((1, Dout), lambda i: (0, 0)),    # bias, VMEM-resident
            ],
            out_specs=pl.BlockSpec((TB, Dout), lambda i: (i, 0)),
        ),
        compiler_params=pltpu.CompilerParams(
            dimension_semantics=("parallel",),   # shard batch across TCs on v7x
            vmem_limit_bytes=vmem_limit,
        ),
        cost_estimate=cost,
    )(x_in, weight_t, b_in)

    return out_p[:B] if B_p > B else out_p


if __name__ == "__main__":
    # Small shapes consistent with the module: pinput dim -> input_dim,
    # poutput dim -> output_dim (number of categories).
    batch = 8
    input_dim = 32
    output_dim = 16

    key = jax.random.PRNGKey(0)
    kx, kw, kb = jax.random.split(key, 3)

    # Deterministic synthetic parameters (Xavier-uniform-like Linear init).
    limit = (6.0 / (input_dim + output_dim)) ** 0.5
    weight_t = jax.random.uniform(
        kw, (input_dim, output_dim), jnp.float32, minval=-limit, maxval=limit
    )
    bias = jax.random.uniform(
        kb, (output_dim,), jnp.float32, minval=-0.01, maxval=0.01
    )
    x = jax.random.normal(kx, (batch, input_dim), jnp.float32)

    probs = categorical_layer_1d(x, weight_t, bias)
    probs = jax.block_until_ready(probs)

    # Reference check (pure JAX).  Tolerance covers possible MXU
    # default-precision (bf16-pass) differences between the Pallas dot and
    # the XLA reference dot on real hardware; in interpret mode both are
    # exact f32 and agree to ~1e-7.
    ref = jax.nn.softmax(x @ weight_t + bias, axis=1)
    assert probs.shape == (batch, output_dim)
    assert bool(jnp.allclose(probs, ref, atol=2e-3, rtol=2e-3))
    # Normalization is exact (plain division), so this is tight.
    assert bool(jnp.allclose(jnp.sum(probs, axis=1), 1.0, atol=1e-5))
    assert bool(jnp.all(probs >= 0.0))

    print("KERNEL_OK")
</pallas_src>

<mosaic_0001>
module attributes {stable_mosaic.version = 11 : i64} {
  func.func @_categorical1d_kernel(%arg0: i32, %arg1: memref<8x32xf32, #tpu.memory_space<vmem>>, %arg2: memref<32x16xf32, #tpu.memory_space<vmem>>, %arg3: memref<1x16xf32, #tpu.memory_space<vmem>>, %arg4: memref<8x16xf32, #tpu.memory_space<vmem>>) attributes {dimension_semantics = [#tpu.dimension_semantics<parallel>], iteration_bounds = array<i64: 1>, scalar_prefetch = 0 : i64, scratch_operands = 0 : i64, tpu.core_type = #tpu.core_type<tc>, window_params = [{transform_indices = @transform_0, window_bounds = array<i64: 8, 32>}, {pipeline_mode = #tpu.pipeline_mode<synchronous>, transform_indices = @transform_1, window_bounds = array<i64: 32, 16>}, {pipeline_mode = #tpu.pipeline_mode<synchronous>, transform_indices = @transform_2, window_bounds = array<i64: 1, 16>}, {transform_indices = @transform_3, window_bounds = array<i64: 8, 16>}]} {
    %c0 = arith.constant 0 : index
    %c0_0 = arith.constant 0 : index
    %0 = vector.load %arg1[%c0, %c0_0] : memref<8x32xf32, #tpu.memory_space<vmem>>, vector<8x32xf32>
    %c0_1 = arith.constant 0 : index
    %c0_2 = arith.constant 0 : index
    %1 = vector.load %arg2[%c0_1, %c0_2] : memref<32x16xf32, #tpu.memory_space<vmem>>, vector<32x16xf32>
    %cst = arith.constant dense<0.000000e+00> : vector<8x16xf32>
    %2 = tpu.matmul %0, %1, %cst {dimension_numbers = #tpu.dot_dimension_numbers<[1], [0], [0], [1], [0, 0, 1, 1], [], []>} : vector<8x32xf32>, vector<32x16xf32>, vector<8x16xf32> -> vector<8x16xf32>
    %c0_3 = arith.constant 0 : index
    %c0_4 = arith.constant 0 : index
    %3 = vector.load %arg3[%c0_3, %c0_4] : memref<1x16xf32, #tpu.memory_space<vmem>>, vector<1x16xf32>
    %4 = vector.broadcast %3 : vector<1x16xf32> to vector<8x16xf32>
    %5 = arith.addf %2, %4 : vector<8x16xf32>
    %cst_5 = arith.constant dense<0xFF800000> : vector<8xf32>
    %6 = vector.multi_reduction <maximumf>, %5, %cst_5 [1] : vector<8x16xf32> to vector<8xf32>
    %7 = vector.shape_cast %6 : vector<8xf32> to vector<8x1xf32>
    %8 = vector.broadcast %7 : vector<8x1xf32> to vector<8x16xf32>
    %9 = arith.subf %5, %8 : vector<8x16xf32>
    %10 = math.exp %9 : vector<8x16xf32>
    %cst_6 = arith.constant dense<0.000000e+00> : vector<8xf32>
    %11 = vector.multi_reduction <add>, %10, %cst_6 [1] : vector<8x16xf32> to vector<8xf32>
    %12 = vector.shape_cast %11 : vector<8xf32> to vector<8x1xf32>
    %13 = vector.broadcast %12 : vector<8x1xf32> to vector<8x16xf32>
    %14 = arith.divf %10, %13 : vector<8x16xf32>
    %c0_7 = arith.constant 0 : index
    %c0_8 = arith.constant 0 : index
    %15 = vector.load %arg4[%c0_7, %c0_8] : memref<8x16xf32, #tpu.memory_space<vmem>>, vector<8x16xf32>
    tpu.vector_store %arg4[%c0_7, %c0_8], %14 {strides = array<i32>} : memref<8x16xf32, #tpu.memory_space<vmem>>, vector<8x16xf32>,
    return
  }
  func.func @transform_0(%arg0: i32) -> (i32, i32) {
    %c0_i32 = arith.constant 0 : i32
    %c0_i32_0 = arith.constant 0 : i32
    return %arg0, %c0_i32 : i32, i32
  }
  func.func @transform_1(%arg0: i32) -> (i32, i32) {
    %c0_i32 = arith.constant 0 : i32
    %c0_i32_0 = arith.constant 0 : i32
    %c0_i32_1 = arith.constant 0 : i32
    return %c0_i32, %c0_i32_0 : i32, i32
  }
  func.func @transform_2(%arg0: i32) -> (i32, i32) {
    %c0_i32 = arith.constant 0 : i32
    %c0_i32_0 = arith.constant 0 : i32
    %c0_i32_1 = arith.constant 0 : i32
    return %c0_i32, %c0_i32_0 : i32, i32
  }
  func.func @transform_3(%arg0: i32) -> (i32, i32) {
    %c0_i32 = arith.constant 0 : i32
    %c0_i32_0 = arith.constant 0 : i32
    return %arg0, %c0_i32 : i32, i32
  }
}

</mosaic_0001>

<bundles_post_ra>
// kernel: tpu_custom_call.1
= control target key start
LH: loop header
LB: loop body
LE: loop exit
PB: predicated region body
PF: predicated region fallthrough
CT: control target
= control target key end

     0   :  { %v175_v1 = vmov 0.0   ;;  %vm176_vm0 = vmmov 0   ;;  %s222_s0 = inlined_call_operand.vmem [shape: f32[8,32], index: 0, kind: input, shape index: {}]   ;;  %s223_s1 = inlined_call_operand.vmem [shape: f32[32,16], index: 1, kind: input, shape index: {}]   ;;  %s224_s2 = inlined_call_operand.vmem [shape: f32[1,16], index: 2, kind: input, shape index: {}]   ;;  %s225_s3 = inlined_call_operand.hbm [shape: f32[8,16], index: 3, kind: output, shape index: {}]  }
   0x1   :  { %v19_v0 = vld [vmem:[%s223_s1 + $0x18] sm:$0xff]  ;;  %135 = vmatprep.subr.mxu0 %v175_v1  ;;  %v18_v2 = vld [vmem:[%s223_s1 + $0x10] sm:$0xff]  ;;  %143 = vmatprep.mubr.msk.f32.mxu0 %vm176_vm0, %v175_v1 }
   0x2   :  { %136 = vmatpush3.msra.mxu0 %v19_v0 }
   0x3   :  { %8 = vsyncpa [#allocation3], 0  ;;  %137 = vmatprep.subr.mxu0 %v175_v1  ;;  %v17_v3 = vld [vmem:[%s223_s1 + $0x8] sm:$0xff]  ;;  %v16_v4 = vld [vmem:[%s223_s1] sm:$0xff]  ;;  %vm27_vm1 = vcmask 261120   ;;  %vm101_vm2 = vcmask 130048  }
   0x4   :  { %138 = vmatpush3.msra.mxu0 %v18_v2  ;;  %v15_v5 = vld [vmem:[%s222_s0] sm:$0xff]  ;;  %s177_s0 = smov [#allocation2]  }
   0x5   :  { %139 = vmatprep.subr.mxu0 %v175_v1  ;;  %v128_v6 = vld [vmem:[%s224_s2] ss:$0 sm:$0xff]  ;;  %s120_s1 = sshll.u32 %s177_s0, 4  ;;  %s121_s1 = int_to_ptr.vmem [resolvable:$true] %s120_s1 }
   0x6   :  { %140 = vmatpush3.msra.mxu0 %v17_v3  ;;  %s153_s2 = scalar_lea.vmem %s121_s1, 128  ;;  %p158_p1 = scmp.lt.s32.totalorder %s121_s1, %s121_s1 }
   0x7   :  { %141 = vmatprep.subr.mxu0 %v175_v1  ;;  %p154_p0 = scmp.ne.s32.totalorder %s121_s1, %s153_s2  ;;  %p159_p2 = scmp.lt.s32.totalorder %s153_s2, %s153_s2 }
   0x8   :  { %142 = vmatpush3.msra.mxu0 %v16_v4 }
   0x9   :  { %144 = vmatmul.mubr.msk.f32.vlgmr.msra.gmra.mxu0 %vm27_vm1, %v15_v5  ;;  %p160_p3 = por %p159_p2, %p158_p1 }
   0xb   :  { %p161_p4 = pnand %p160_p3, %p154_p0 }
  0xc9   :  { %v97_v7 = vpop.f32.mrf.mxu0 }
  0xca   :  { %v98_v8 = vadd.f32 %v128_v6, %v97_v7 }
  0xcb   :  { %v145_v9 = vpop.f32.mrf.mxu0 }
  0xcc   :  { %v102_v10 = vsel %vm101_vm2, %v98_v8, -inf }
  0xcd   :  { %103 = vmax.xlane.f32.xlu0 %v102_v10 }
 0x156   :  { %v104_v11 = vpop.xlane.xlu0 %103 }
 0x157   :  { %v105_v12 = vsub.f32 %v98_v8, %v104_v11 }
 0x159   :  { %v106_v13 = vmul.f32 1.442695, %v105_v12 }
 0x15b   :  { %149 = vpow2.f32 %v106_v13 }
 0x168   :  { %v150_v14 = vpop.eup %149 }
 0x169   :  { %v108_v15 = vsel %vm101_vm2, %v150_v14, 0.0 }
 0x16a   :  { %109 = vadd.xlane.f32.xlu0 %v108_v15 }
 0x1f3   :  { %v110_v16 = vpop.xlane.xlu0 %109 }
 0x1f4   :  { %151 = vrcp.f32 %v110_v16 }
 0x201   :  { %v152_v17 = vpop.eup %151 }
 0x202   :  { %v112_v18 = vmul.f32 %v152_v17, %v150_v14 }
 0x204   :  { %113 = vst.msk [vmem:[#allocation2] sm:$0xff] %vm101_vm2, %v112_v18 }
 0x205   :  { %164 = shalt.err (!%p161_p4)
}
 0x206   :  { %123 = dma.vmem_to_hbm [thread:$0]  %s121_s1, 128, %s225_s3, [#allocation3]  }
 0x207   :  { %173 = dma.done.wait [#allocation3], 128  }
 0x208   :  { %174 = vsyncadd [#allocation3], 4294967168 }
 0x209   :  { %127 = vsyncpa [#allocation3], 1 }

</bundles_post_ra>
